<compile_context>
chip_gen: v6e
topology: v6e:2x2x1
jax: 0.10.0
libtpu: 0.0.40
codegen_flags: <defaults>
</compile_context>

<pallas_src>
import functools
import math

import jax
import jax.numpy as jnp
from jax.experimental import pallas as pl
from jax.experimental.pallas import tpu as pltpu


_INV_SQRT2 = 1.0 / math.sqrt(2.0)


# ---------------------------------------------------------------------------
# Pallas kernels
# ---------------------------------------------------------------------------

def _layernorm(v, w, b, eps=1e-5):
    # v: (N, D) float32, w/b: (1, D) float32
    mu = jnp.mean(v, axis=-1, keepdims=True)
    var = jnp.mean((v - mu) ** 2, axis=-1, keepdims=True)
    return (v - mu) * jax.lax.rsqrt(var + eps) * w + b


def _patch_embed_kernel(p_ref, w_ref, b_ref, o_ref):
    # p: (tm, C*p*p) f32, w: (C*p*p, D) bf16, b: (1, D) f32
    o_ref[...] = (
        jnp.dot(p_ref[...].astype(jnp.bfloat16), w_ref[...],
                preferred_element_type=jnp.float32)
        + b_ref[...]
    ).astype(o_ref.dtype)


def _transformer_kernel(x_ref, ln1w_ref, ln1b_ref, wq_ref, wk_ref, wv_ref,
                        wo_ref, bo_ref, ln2w_ref, ln2b_ref,
                        w1_ref, b1_ref, w2_ref, b2_ref, o_ref,
                        *, heads, scale, n_real):
    # grid = (batch, depth); o_ref is the VMEM-resident residual stream
    # (same output block revisited across the depth axis).
    @pl.when(pl.program_id(1) == 0)
    def _init():
        o_ref[...] = x_ref[...]

    x = o_ref[0]                                   # (N, D) float32
    N, D = x.shape
    bf16 = jnp.bfloat16

    # ---- Residual(PreNorm(Attention)) ----
    xn = _layernorm(x, ln1w_ref[0], ln1b_ref[0])
    xh = jnp.broadcast_to(xn.astype(bf16)[None], (heads, N, D))        # (H,N,D)

    # batched (leading-head) projections; contraction over the full D axis
    q = jnp.einsum('hnd,hdf->hnf', xh, wq_ref[0],
                   preferred_element_type=jnp.float32)                 # (H,N,dh)
    k = jnp.einsum('hnd,hdf->hnf', xh, wk_ref[0],
                   preferred_element_type=jnp.float32)
    v = jnp.einsum('hnd,hdf->hnf', xh, wv_ref[0],
                   preferred_element_type=jnp.float32)

    dots = jnp.einsum('hnd,hmd->hnm', q.astype(bf16), k.astype(bf16),
                      preferred_element_type=jnp.float32) * scale      # (H,N,N)
    if n_real < N:                                 # mask padded key columns
        col = jax.lax.broadcasted_iota(jnp.int32, dots.shape, 2)
        dots = jnp.where(col < n_real, dots, -1e30)

    dots = dots - jnp.max(dots, axis=-1, keepdims=True)
    e = jnp.exp(dots)
    attn = e * pl.reciprocal(jnp.sum(e, axis=-1, keepdims=True), approx=True)

    ho = jnp.einsum('hnm,hmd->hnd', attn.astype(bf16), v.astype(bf16),
                    preferred_element_type=jnp.float32)                # (H,N,dh)
    # accumulate each head directly into the wo projection (no lane concat)
    proj = jnp.einsum('hnf,hfd->hnd', ho.astype(bf16), wo_ref[0],
                      preferred_element_type=jnp.float32)              # (H,N,D)
    x = x + jnp.sum(proj, axis=0) + bo_ref[0]

    # ---- Residual(PreNorm(FeedForward)) ----
    h = _layernorm(x, ln2w_ref[0], ln2b_ref[0])
    h = jnp.dot(h.astype(bf16), w1_ref[0],
                preferred_element_type=jnp.float32) + b1_ref[0]
    # exact (erf-based) GELU, matching torch.nn.GELU default
    h = 0.5 * h * (1.0 + jax.lax.erf(h * _INV_SQRT2))
    h = jnp.dot(h.astype(bf16), w2_ref[0],
                preferred_element_type=jnp.float32) + b2_ref[0]
    x = x + h

    o_ref[0] = x.astype(o_ref.dtype)


def _head_kernel(x_ref, lnw_ref, lnb_ref, hw_ref, hb_ref, o_ref):
    xn = _layernorm(x_ref[...], lnw_ref[...], lnb_ref[...])
    o_ref[...] = (
        jnp.dot(xn.astype(jnp.bfloat16), hw_ref[...],
                preferred_element_type=jnp.float32) + hb_ref[...]
    ).astype(o_ref.dtype)


# ---------------------------------------------------------------------------
# Wrappers
# ---------------------------------------------------------------------------

def _full_spec(shape):
    n = len(shape)
    return pl.BlockSpec(shape, lambda *args, n=n: (0,) * n)


def patch_embed_pallas(patches, w, b):
    M, K = patches.shape
    D = w.shape[1]
    # Row tile sized toward the MXU (256 on v6e/v7x, 128 on v5e); fall back to
    # a single full-extent tile for tiny inputs.
    if M % 256 == 0:
        tm = 256
    elif M % 128 == 0:
        tm = 128
    else:
        tm = M
    return pl.pallas_call(
        _patch_embed_kernel,
        out_shape=jax.ShapeDtypeStruct((M, D), jnp.float32),
        grid=(M // tm,),
        in_specs=[pl.BlockSpec((tm, K), lambda i: (i, 0)),
                  pl.BlockSpec((K, D), lambda i: (0, 0)),
                  pl.BlockSpec((1, D), lambda i: (0, 0))],
        out_specs=pl.BlockSpec((tm, D), lambda i: (i, 0)),
        compiler_params=pltpu.CompilerParams(
            dimension_semantics=("parallel",)),
    )(patches, w, b)


def transformer_stack_pallas(x, blk, heads, scale, n_real):
    # x: (B, N_pad, D) float32; blk: dict of (depth, ...) stacked weights.
    B, N, D = x.shape
    names = ["ln1_w", "ln1_b", "wq", "wk", "wv", "wo", "bo",
             "ln2_w", "ln2_b", "w1", "b1", "w2", "b2"]
    args = [blk[n] for n in names]
    depth = blk["wq"].shape[0]

    def wspec(shape):
        nd = len(shape)
        return pl.BlockSpec((1,) + tuple(shape[1:]),
                            lambda b, d, nd=nd: (d,) + (0,) * (nd - 1))

    in_specs = [pl.BlockSpec((1, N, D), lambda b, d: (b, 0, 0))]
    in_specs += [wspec(a.shape) for a in args]

    kernel = functools.partial(_transformer_kernel, heads=heads, scale=scale,
                               n_real=n_real)
    return pl.pallas_call(
        kernel,
        out_shape=jax.ShapeDtypeStruct((B, N, D), jnp.float32),
        grid=(B, depth),
        in_specs=in_specs,
        out_specs=pl.BlockSpec((1, N, D), lambda b, d: (b, 0, 0)),
        input_output_aliases={0: 0},
        compiler_params=pltpu.CompilerParams(
            dimension_semantics=("parallel", "arbitrary"),
            vmem_limit_bytes=64 * 1024 * 1024),
    )(x, *args)


def head_pallas(x_cls, ln_w, ln_b, head_w, head_b):
    B, D = x_cls.shape
    C = head_w.shape[1]
    return pl.pallas_call(
        _head_kernel,
        out_shape=jax.ShapeDtypeStruct((B, C), jnp.float32),
        grid=(1,),
        in_specs=[_full_spec((B, D)), _full_spec((1, D)), _full_spec((1, D)),
                  _full_spec((D, C)), _full_spec((1, C))],
        out_specs=_full_spec((B, C)),
    )(x_cls, ln_w, ln_b, head_w, head_b)


# ---------------------------------------------------------------------------
# ViT forward (glue in plain JAX)
# ---------------------------------------------------------------------------

def extract_patches(img, patch):
    # img: (B, C, H, W) -> (B, num_patches, C*patch*patch)
    # flatten order (c, i, j), matching Conv2d weight (D, C, p, p).
    B, C, H, W = img.shape
    hp, wp = H // patch, W // patch
    x = img.reshape(B, C, hp, patch, wp, patch)
    x = x.transpose(0, 2, 4, 1, 3, 5)            # (B, hp, wp, C, p, p)
    return x.reshape(B, hp * wp, C * patch * patch)


def init_vit_params(key, image_size, patch_size, num_classes, dim, depth,
                    heads, mlp_dim, channels):
    num_patches = (image_size // patch_size) ** 2
    dh = dim // heads
    ks = jax.random.split(key, 12)
    s = 0.02
    bf16 = jnp.bfloat16
    params = {
        "proj_w": (s * jax.random.normal(
            ks[0], (channels * patch_size * patch_size, dim),
            jnp.float32)).astype(bf16),
        "proj_b": s * jax.random.normal(ks[1], (1, dim), jnp.float32),
        "pos_embed": jax.random.normal(ks[2], (1, num_patches + 1, dim),
                                       jnp.float32),
        "cls_token": jax.random.normal(ks[3], (1, 1, dim), jnp.float32),
        "norm_w": jnp.ones((1, dim), jnp.float32),
        "norm_b": jnp.zeros((1, dim), jnp.float32),
        "head_w": (s * jax.random.normal(ks[4], (dim, num_classes),
                                         jnp.float32)).astype(bf16),
        "head_b": jnp.zeros((1, num_classes), jnp.float32),
        # per-block weights stacked along a leading depth axis; head weights
        # pre-reshaped to (heads, dim, dh) / (heads, dh, dim) so the kernel
        # needs no in-kernel lane reshapes/transposes.
        "blocks": {
            "ln1_w": jnp.ones((depth, 1, dim), jnp.float32),
            "ln1_b": jnp.zeros((depth, 1, dim), jnp.float32),
            "wq": (s * jax.random.normal(ks[5], (depth, heads, dim, dh),
                                         jnp.float32)).astype(bf16),
            "wk": (s * jax.random.normal(ks[6], (depth, heads, dim, dh),
                                         jnp.float32)).astype(bf16),
            "wv": (s * jax.random.normal(ks[7], (depth, heads, dim, dh),
                                         jnp.float32)).astype(bf16),
            "wo": (s * jax.random.normal(ks[8], (depth, heads, dh, dim),
                                         jnp.float32)).astype(bf16),
            "bo": s * jax.random.normal(ks[9], (depth, 1, dim), jnp.float32),
            "ln2_w": jnp.ones((depth, 1, dim), jnp.float32),
            "ln2_b": jnp.zeros((depth, 1, dim), jnp.float32),
            "w1": (s * jax.random.normal(ks[10], (depth, dim, mlp_dim),
                                         jnp.float32)).astype(bf16),
            "b1": jnp.zeros((depth, 1, mlp_dim), jnp.float32),
            "w2": (s * jax.random.normal(ks[11], (depth, mlp_dim, dim),
                                         jnp.float32)).astype(bf16),
            "b2": jnp.zeros((depth, 1, dim), jnp.float32),
        },
    }
    return params


def vit_forward(img, params, *, patch_size, dim, heads):
    B = img.shape[0]
    # patch embedding (conv with kernel==stride == patch-flatten + matmul)
    patches = extract_patches(img, patch_size)                   # (B, Np, Cpp)
    Np, Cpp = patches.shape[1], patches.shape[2]
    x = patch_embed_pallas(patches.reshape(B * Np, Cpp),
                           params["proj_w"], params["proj_b"])
    x = x.reshape(B, Np, dim)

    # prepend cls token, add positional embedding (square image => identity
    # path of interpolate_pos_encoding)
    cls = jnp.broadcast_to(params["cls_token"], (B, 1, dim))
    x = jnp.concatenate([cls, x], axis=1) + params["pos_embed"]  # (B, Np+1, D)

    # pad token axis up to a multiple of 8 sublanes; padded key columns are
    # masked inside the attention kernel.
    n_real = Np + 1
    n_pad = ((n_real + 7) // 8) * 8
    if n_pad != n_real:
        x = jnp.pad(x, ((0, 0), (0, n_pad - n_real), (0, 0)))

    # fused transformer stack (all blocks in one pallas_call)
    scale = float(dim) ** (-0.5)   # matches the reference module (dim, not dh)
    x = transformer_stack_pallas(x, params["blocks"], heads, scale, n_real)

    # cls token -> LayerNorm -> classification head
    x_cls = x[:, 0]                                              # (B, D)
    return head_pallas(x_cls, params["norm_w"], params["norm_b"],
                       params["head_w"], params["head_b"])


# ---------------------------------------------------------------------------
# main
# ---------------------------------------------------------------------------

if __name__ == "__main__":
    # Small ViT config
    image_size = 16
    patch_size = 4
    channels = 3
    dim = 32
    depth = 2
    heads = 4
    mlp_dim = 64
    num_classes = 10
    batch = 2

    key = jax.random.PRNGKey(0)
    k_img, k_params = jax.random.split(key)
    img = jax.random.normal(k_img, (batch, channels, image_size, image_size),
                            jnp.float32)
    params = init_vit_params(k_params, image_size, patch_size, num_classes,
                             dim, depth, heads, mlp_dim, channels)

    out = vit_forward(img, params, patch_size=patch_size, dim=dim, heads=heads)
    out = jax.block_until_ready(out)
    assert out.shape == (batch, num_classes), out.shape
    assert bool(jnp.all(jnp.isfinite(out)))
    print("KERNEL_OK")
</pallas_src>

<mosaic_0001>
module attributes {stable_mosaic.version = 11 : i64} {
  func.func @_patch_embed_kernel(%arg0: i32, %arg1: memref<32x48xf32, #tpu.memory_space<vmem>>, %arg2: memref<48x32xbf16, #tpu.memory_space<vmem>>, %arg3: memref<1x32xf32, #tpu.memory_space<vmem>>, %arg4: memref<32x32xf32, #tpu.memory_space<vmem>>) attributes {dimension_semantics = [#tpu.dimension_semantics<parallel>], iteration_bounds = array<i64: 1>, scalar_prefetch = 0 : i64, scratch_operands = 0 : i64, tpu.core_type = #tpu.core_type<tc>, window_params = [{transform_indices = @transform_0, window_bounds = array<i64: 32, 48>}, {pipeline_mode = #tpu.pipeline_mode<synchronous>, transform_indices = @transform_1, window_bounds = array<i64: 48, 32>}, {pipeline_mode = #tpu.pipeline_mode<synchronous>, transform_indices = @transform_2, window_bounds = array<i64: 1, 32>}, {transform_indices = @transform_3, window_bounds = array<i64: 32, 32>}]} {
    %c0 = arith.constant 0 : index
    %c0_0 = arith.constant 0 : index
    %0 = vector.load %arg1[%c0, %c0_0] : memref<32x48xf32, #tpu.memory_space<vmem>>, vector<32x48xf32>
    %1 = arith.truncf %0 : vector<32x48xf32> to vector<32x48xbf16>
    %c0_1 = arith.constant 0 : index
    %c0_2 = arith.constant 0 : index
    %2 = vector.load %arg2[%c0_1, %c0_2] : memref<48x32xbf16, #tpu.memory_space<vmem>>, vector<48x32xbf16>
    %cst = arith.constant dense<0.000000e+00> : vector<32x32xf32>
    %3 = tpu.matmul %1, %2, %cst {dimension_numbers = #tpu.dot_dimension_numbers<[1], [0], [0], [1], [0, 0, 1, 1], [], []>} : vector<32x48xbf16>, vector<48x32xbf16>, vector<32x32xf32> -> vector<32x32xf32>
    %c0_3 = arith.constant 0 : index
    %c0_4 = arith.constant 0 : index
    %4 = vector.load %arg3[%c0_3, %c0_4] : memref<1x32xf32, #tpu.memory_space<vmem>>, vector<1x32xf32>
    %5 = vector.broadcast %4 : vector<1x32xf32> to vector<32x32xf32>
    %6 = arith.addf %3, %5 : vector<32x32xf32>
    %c0_5 = arith.constant 0 : index
    %c0_6 = arith.constant 0 : index
    %7 = vector.load %arg4[%c0_5, %c0_6] : memref<32x32xf32, #tpu.memory_space<vmem>>, vector<32x32xf32>
    tpu.vector_store %arg4[%c0_5, %c0_6], %6 {strides = array<i32>} : memref<32x32xf32, #tpu.memory_space<vmem>>, vector<32x32xf32>,
    return
  }
  func.func @transform_0(%arg0: i32) -> (i32, i32) {
    %c0_i32 = arith.constant 0 : i32
    %c0_i32_0 = arith.constant 0 : i32
    return %arg0, %c0_i32 : i32, i32
  }
  func.func @transform_1(%arg0: i32) -> (i32, i32) {
    %c0_i32 = arith.constant 0 : i32
    %c0_i32_0 = arith.constant 0 : i32
    %c0_i32_1 = arith.constant 0 : i32
    return %c0_i32, %c0_i32_0 : i32, i32
  }
  func.func @transform_2(%arg0: i32) -> (i32, i32) {
    %c0_i32 = arith.constant 0 : i32
    %c0_i32_0 = arith.constant 0 : i32
    %c0_i32_1 = arith.constant 0 : i32
    return %c0_i32, %c0_i32_0 : i32, i32
  }
  func.func @transform_3(%arg0: i32) -> (i32, i32) {
    %c0_i32 = arith.constant 0 : i32
    %c0_i32_0 = arith.constant 0 : i32
    return %arg0, %c0_i32 : i32, i32
  }
}

</mosaic_0001>

<bundles_post_ra>
// kernel: tpu_custom_call.1
= control target key start
LH: loop header
LB: loop body
LE: loop exit
PB: predicated region body
PF: predicated region fallthrough
CT: control target
= control target key end

     0   :  { %vm53_vm0 = vcmask 392192   ;;  %s229_s0 = inlined_call_operand.vmem [shape: f32[32,48], index: 0, kind: input, shape index: {}]   ;;  %s230_s1 = inlined_call_operand.vmem [shape: bf16[48,32], index: 1, kind: input, shape index: {}]   ;;  %s231_s2 = inlined_call_operand.vmem [shape: f32[1,32], index: 2, kind: input, shape index: {}]   ;;  %s232_s3 = inlined_call_operand.hbm [shape: f32[32,32], index: 3, kind: output, shape index: {}]  }
   0x1   :  { %v154_v0 = vld [vmem:[%s230_s1 + $0x10] sm:$0xff]   ;;  %v155_v1 = vld [vmem:[%s230_s1 + $0x8] sm:$0xff]   ;;  %v16_v2 = vld [vmem:[%s229_s0] sm:$0xff] }
   0x2   :  { %141 = vmatprep.subr.bf16.mxu0 %v154_v0  ;;  %v17_v3 = vld [vmem:[%s229_s0 + $0x8] sm:$0xff]  ;;  %v156_v4 = vld [vmem:[%s230_s1] sm:$0xff]  }
   0x3   :  { %142 = vmatpush3.bf16.msra.mxu0 %v154_v0  ;;  %v20_v5 = vpack.c.bf16 %v17_v3, %v16_v2 }
   0x4   :  { %143 = vmatprep.subr.bf16.mxu0 %v155_v1 }
   0x5   :  { %8 = vsyncpa [#allocation3], 0  ;;  %147 = vmatprep.mubr.msk.bf16.mxu0 %vm53_vm0, %v20_v5  ;;  %v18_v6 = vld [vmem:[%s229_s0 + $0x10] sm:$0xff]  ;;  %v19_v7 = vld [vmem:[%s229_s0 + $0x18] sm:$0xff]  ;;  %vm109_vm1 = vcmask 261120   ;;  %s179_s1 = smov [#allocation2]  }
   0x6   :  { %v21_v8 = vpack.c.bf16 %v19_v7, %v18_v6  ;;  %v130_v9 = vld [vmem:[%s231_s2] ss:$0 sm:$0xff]  ;;  %s119_s28 = sshll.u32 %s179_s1, 4  ;;  %s120_s28 = int_to_ptr.vmem [resolvable:$true] %s119_s28 }
   0x7   :  { %144 = vmatpush3.bf16.msra.mxu0 %v155_v1  ;;  %s157_s0 = scalar_lea.vmem %s120_s28, 512  ;;  %p162_p1 = scmp.lt.s32.totalorder %s120_s28, %s120_s28 }
   0x8   :  { %145 = vmatprep.subr.bf16.mxu0 %v156_v4  ;;  %p158_p0 = scmp.ne.s32.totalorder %s120_s28, %s157_s0  ;;  %p163_p2 = scmp.lt.s32.totalorder %s157_s0, %s157_s0 }
   0xa   :  { %p164_p3 = por %p163_p2, %p162_p1 }
   0xb   :  { %146 = vmatpush3.bf16.msra.mxu0 %v156_v4 }
   0xc   :  { %p165_p4 = pnand %p164_p3, %p158_p0 }
   0xe   :  { %148 = vmatmul.mubr.msk.bf16.vlgmr.msra.gmra.mxu0 %vm53_vm0, %v21_v8 }
  0xce   :  { %v149_v10 = vpop.f32.mrf.mxu0 }
  0xcf   :  { %v103_v11 = vadd.f32 %v149_v10, %v130_v9 }
  0xd0   :  { %v94_v12 = vpop.f32.mrf.mxu0 }
  0xd1   :  { %112 = vst.msk [vmem:[#allocation2 + $0x10] sm:$0xff] %vm109_vm1, %v103_v11  ;;  %v95_v13 = vadd.f32 %v130_v9, %v94_v12 }
  0xd2   :  { %v150_v14 = vpop.f32.mrf.mxu0 }
  0xd3   :  { %110 = vst.msk [vmem:[#allocation2] sm:$0xff] %vm109_vm1, %v95_v13  ;;  %v106_v15 = vadd.f32 %v150_v14, %v130_v9 }
  0xd4   :  { %v97_v16 = vpop.f32.mrf.mxu0 }
  0xd5   :  { %113 = vst.msk [vmem:[#allocation2 + $0x18] sm:$0xff] %vm109_vm1, %v106_v15  ;;  %v98_v17 = vadd.f32 %v130_v9, %v97_v16 }
  0xd7   :  { %111 = vst.msk [vmem:[#allocation2 + $0x8] sm:$0xff] %vm109_vm1, %v98_v17 }
  0xd8   :  { %168 = shalt.err (!%p165_p4)
}
  0xd9   :  { %s180_s2 = smov 128   ;;  %s181_s29 = smov 8  }
  0xda   :  { %125 = dma.vmem_to_hbm [thread:$0]  %s120_s28, 512, %s232_s3, [#allocation3], %s180_s2, %s180_s2, %s181_s29  }
  0xdb   :  { %177 = dma.done.wait [#allocation3], 512  }
  0xdc   :  { %178 = vsyncadd [#allocation3], 4294966784 }
  0xdd   :  { %129 = vsyncpa [#allocation3], 1 }

</bundles_post_ra>
